<compile_context>
chip_gen: v7x
topology: tpu7x:2x2x1
jax: 0.10.0
libtpu: 0.0.40
codegen_flags: <defaults>
</compile_context>

<pallas_src>
import math

import jax
import jax.numpy as jnp
from jax.experimental import pallas as pl
from jax.experimental.pallas import tpu as pltpu

_LANES = 128
_SUBLANES = 8
_NUM_CORES = 2                 # v7x has 2 TCs; a serial no-op split on v5e/v6e
_TARGET_BLOCK_ROWS = 4096      # ~2 MiB per f32 input block
_MIN_PALLAS_NUMEL = 4096       # below this, a fused XLA reduce is faster


def _round_up(x, m):
    return ((x + m - 1) // m) * m


def _regular_loss_kernel(mean_ref, var_ref, acc_ref):
    """Accumulate sum(exp(var) - (1+var) + mean^2) into a lane-parallel
    (8, 128) accumulator resident in the output block."""
    i = pl.program_id(1)

    @pl.when(i == 0)
    def _():
        acc_ref[...] = jnp.zeros_like(acc_ref)

    m = mean_ref[...].astype(jnp.float32)
    v = var_ref[...].astype(jnp.float32)
    contrib = jnp.exp(v) - (1.0 + v) + m * m          # (block_rows, 128)
    # Layout-trivial regroup into (block_rows//8, 8, 128) vregs, then add them
    # together: pure VPU work, no cross-lane (XLU) reduce in the steady state.
    acc_ref[...] += contrib.reshape(-1, _SUBLANES, _LANES).sum(axis=0)


def regular_loss(mean, var, codes=None, labels=None, *,
                 target_block_rows=_TARGET_BLOCK_ROWS):
    """Pallas implementation of RegularLoss.forward (codes/labels unused,
    exactly as in the PyTorch module)."""
    assert mean.shape == var.shape
    numel = math.prod(mean.shape)

    if numel < _MIN_PALLAS_NUMEL:
        # Tiny tensors: kernel launch + pipeline prologue dwarfs the work.
        m = mean.astype(jnp.float32)
        v = var.astype(jnp.float32)
        return jnp.mean(jnp.exp(v) - (1.0 + v) + m * m)

    # Lane-dense layout: flatten, zero-pad (padding contributes 0 to the sum),
    # reshape to [total_rows, 128], split contiguously across cores/steps.
    rows_needed = pl.cdiv(numel, _LANES)
    block_rows = min(int(target_block_rows),
                     _round_up(pl.cdiv(rows_needed, _NUM_CORES), _SUBLANES))
    block_rows = _round_up(block_rows, _SUBLANES)
    total_rows = _round_up(rows_needed, _NUM_CORES * block_rows)
    steps = total_rows // (_NUM_CORES * block_rows)
    padded_numel = total_rows * _LANES

    def _prep(x):
        x = x.reshape(-1)
        if padded_numel != numel:
            x = jnp.pad(x, (0, padded_numel - numel))
        return x.reshape(total_rows, _LANES)

    mean2d = _prep(mean)
    var2d = _prep(var)

    in_spec = pl.BlockSpec((block_rows, _LANES),
                           lambda c, i: (c * steps + i, 0))
    # Squeezed leading dim: kernel sees an (8, 128) accumulator per core.
    out_spec = pl.BlockSpec((None, _SUBLANES, _LANES), lambda c, i: (c, 0, 0))

    partial = pl.pallas_call(
        _regular_loss_kernel,
        out_shape=jax.ShapeDtypeStruct((_NUM_CORES, _SUBLANES, _LANES),
                                       jnp.float32),
        grid_spec=pltpu.PrefetchScalarGridSpec(
            num_scalar_prefetch=0,
            grid=(_NUM_CORES, steps),
            in_specs=[in_spec, in_spec],
            out_specs=out_spec,
        ),
        compiler_params=pltpu.CompilerParams(
            dimension_semantics=("parallel", "arbitrary"),
        ),
    )(mean2d, var2d)

    # Final cross-lane/core reduce + mean scale (cheap, done once in XLA).
    return jnp.sum(partial) * (1.0 / numel)


class RegularLossPallas:
    """Mirror of the PyTorch module; center_table is an unused buffer."""

    def __init__(self, num_label, z_dim):
        self.num_label = num_label
        self.z_dim = z_dim
        # Deterministic init matching torch.ones(num_label, z_dim) * 10.
        self.center_table = jnp.ones((num_label, z_dim), jnp.float32) * 10.0

    def __call__(self, mean, var, codes, labels):
        return regular_loss(mean, var, codes, labels)


def _reference(mean, var):
    m = mean.astype(jnp.float32)
    v = var.astype(jnp.float32)
    return jnp.mean(jnp.exp(v) - (1.0 + v) + m * m)


if __name__ == "__main__":
    key = jax.random.PRNGKey(0)
    k_mean, k_var, k_codes, k_labels = jax.random.split(key, 4)

    NUM_LABEL = 10

    def make_inputs(B, Z):
        mean = jax.random.normal(k_mean, (B, Z), dtype=jnp.float32)
        var = jax.random.normal(k_var, (B, Z), dtype=jnp.float32) * 0.5
        codes = jax.random.normal(k_codes, (B, Z), dtype=jnp.float32)  # unused
        labels = jax.random.randint(k_labels, (B,), 0, NUM_LABEL)      # unused
        return mean, var, codes, labels

    module = RegularLossPallas(NUM_LABEL, 512)

    # 1) Main Pallas path (lane-aligned shape, one grid step per core).
    mean, var, codes, labels = make_inputs(64, 512)
    loss = jax.block_until_ready(module(mean, var, codes, labels))
    ref = _reference(mean, var)
    assert jnp.allclose(loss, ref, rtol=1e-5, atol=1e-5), (loss, ref)

    # 2) Pallas path with multiple accumulation steps per core.
    loss = jax.block_until_ready(
        regular_loss(mean, var, codes, labels, target_block_rows=32))
    assert jnp.allclose(loss, ref, rtol=1e-5, atol=1e-5), (loss, ref)

    # 3) Pallas path with a non-lane-divisible size (exercises zero padding).
    mean, var, codes, labels = make_inputs(50, 96)
    loss = jax.block_until_ready(module(mean, var, codes, labels))
    ref = _reference(mean, var)
    assert jnp.allclose(loss, ref, rtol=1e-5, atol=1e-5), (loss, ref)

    # 4) Tiny-input bypass (plain XLA path, matches PyTorch semantics too).
    mean, var, codes, labels = make_inputs(16, 32)
    loss = jax.block_until_ready(module(mean, var, codes, labels))
    ref = _reference(mean, var)
    assert jnp.allclose(loss, ref, rtol=1e-5, atol=1e-5), (loss, ref)

    print("KERNEL_OK")
</pallas_src>

<mosaic_0001>
module attributes {stable_mosaic.version = 11 : i64} {
  func.func @_regular_loss_kernel(%arg0: i32, %arg1: i32, %arg2: memref<128x128xf32, #tpu.memory_space<vmem>>, %arg3: memref<128x128xf32, #tpu.memory_space<vmem>>, %arg4: memref<1x8x128xf32, #tpu.memory_space<vmem>>) attributes {dimension_semantics = [#tpu.dimension_semantics<parallel>, #tpu.dimension_semantics<arbitrary>], iteration_bounds = array<i64: 2, 1>, scalar_prefetch = 0 : i64, scratch_operands = 0 : i64, tpu.core_type = #tpu.core_type<tc>, window_params = [{transform_indices = @transform_0, window_bounds = array<i64: 128, 128>}, {transform_indices = @transform_1, window_bounds = array<i64: 128, 128>}, {transform_indices = @transform_2, window_bounds = array<i64: 1, 8, 128>}]} {
    %c0_i32 = arith.constant 0 : i32
    %0 = arith.cmpi eq, %arg1, %c0_i32 : i32
    %1 = arith.extui %0 : i1 to i32
    %c0_i32_0 = arith.constant 0 : i32
    %2 = arith.cmpi ne, %1, %c0_i32_0 : i32
    scf.if %2 {
      %cst_11 = arith.constant 0.000000e+00 : f32
      %19 = vector.broadcast %cst_11 : f32 to vector<8x128xf32>
      %c0_12 = arith.constant 0 : index
      %c0_13 = arith.constant 0 : index
      %c0_14 = arith.constant 0 : index
      %20 = vector.load %arg4[%c0_12, %c0_13, %c0_14] : memref<1x8x128xf32, #tpu.memory_space<vmem>>, vector<1x8x128xf32>
      %21 = vector.shape_cast %20 : vector<1x8x128xf32> to vector<8x128xf32>
      %22 = vector.shape_cast %19 : vector<8x128xf32> to vector<1x8x128xf32>
      tpu.vector_store %arg4[%c0_12, %c0_13, %c0_14], %22 {strides = array<i32>} : memref<1x8x128xf32, #tpu.memory_space<vmem>>, vector<1x8x128xf32>,
    } else {
    }
    %c0 = arith.constant 0 : index
    %c0_1 = arith.constant 0 : index
    %3 = vector.load %arg2[%c0, %c0_1] : memref<128x128xf32, #tpu.memory_space<vmem>>, vector<128x128xf32>
    %c0_2 = arith.constant 0 : index
    %c0_3 = arith.constant 0 : index
    %4 = vector.load %arg3[%c0_2, %c0_3] : memref<128x128xf32, #tpu.memory_space<vmem>>, vector<128x128xf32>
    %5 = math.exp %4 : vector<128x128xf32>
    %cst = arith.constant 1.000000e+00 : f32
    %6 = vector.broadcast %cst : f32 to vector<128x128xf32>
    %7 = arith.addf %6, %4 : vector<128x128xf32>
    %8 = arith.subf %5, %7 : vector<128x128xf32>
    %9 = arith.mulf %3, %3 : vector<128x128xf32>
    %10 = arith.addf %8, %9 : vector<128x128xf32>
    %c0_4 = arith.constant 0 : index
    %c0_5 = arith.constant 0 : index
    %c0_6 = arith.constant 0 : index
    %11 = vector.load %arg4[%c0_4, %c0_5, %c0_6] : memref<1x8x128xf32, #tpu.memory_space<vmem>>, vector<1x8x128xf32>
    %12 = vector.shape_cast %11 : vector<1x8x128xf32> to vector<8x128xf32>
    %13 = vector.shape_cast %10 : vector<128x128xf32> to vector<16x8x128xf32>
    %cst_7 = arith.constant dense<0.000000e+00> : vector<8x128xf32>
    %14 = vector.multi_reduction <add>, %13, %cst_7 [0] : vector<16x8x128xf32> to vector<8x128xf32>
    %15 = arith.addf %12, %14 : vector<8x128xf32>
    %c0_8 = arith.constant 0 : index
    %c0_9 = arith.constant 0 : index
    %c0_10 = arith.constant 0 : index
    %16 = vector.load %arg4[%c0_8, %c0_9, %c0_10] : memref<1x8x128xf32, #tpu.memory_space<vmem>>, vector<1x8x128xf32>
    %17 = vector.shape_cast %16 : vector<1x8x128xf32> to vector<8x128xf32>
    %18 = vector.shape_cast %15 : vector<8x128xf32> to vector<1x8x128xf32>
    tpu.vector_store %arg4[%c0_8, %c0_9, %c0_10], %18 {strides = array<i32>} : memref<1x8x128xf32, #tpu.memory_space<vmem>>, vector<1x8x128xf32>,
    return
  }
  func.func @transform_0(%arg0: i32, %arg1: i32) -> (i32, i32) {
    %c1_i32 = arith.constant 1 : i32
    %0 = arith.muli %arg0, %c1_i32 : i32
    %1 = arith.addi %0, %arg1 : i32
    %c0_i32 = arith.constant 0 : i32
    %c0_i32_0 = arith.constant 0 : i32
    return %1, %c0_i32 : i32, i32
  }
  func.func @transform_1(%arg0: i32, %arg1: i32) -> (i32, i32) {
    %c1_i32 = arith.constant 1 : i32
    %0 = arith.muli %arg0, %c1_i32 : i32
    %1 = arith.addi %0, %arg1 : i32
    %c0_i32 = arith.constant 0 : i32
    %c0_i32_0 = arith.constant 0 : i32
    return %1, %c0_i32 : i32, i32
  }
  func.func @transform_2(%arg0: i32, %arg1: i32) -> (i32, i32, i32) {
    %c0_i32 = arith.constant 0 : i32
    %c0_i32_0 = arith.constant 0 : i32
    %c0_i32_1 = arith.constant 0 : i32
    return %arg0, %c0_i32, %c0_i32_0 : i32, i32, i32
  }
}

</mosaic_0001>

<bundles_post_ra>
// kernel: tpu_custom_call.1
= control target key start
LH: loop header
LB: loop body
LE: loop exit
PB: predicated region body
PF: predicated region fallthrough
CT: control target
= control target key end

     0   :  { %7 = vsyncpa [#allocation3], 0  ;;  %s1085_s0 = inlined_call_operand.hbm [shape: f32[256,128], index: 0, kind: input, shape index: {}]   ;;  %s1086_s1 = inlined_call_operand.hbm [shape: f32[256,128], index: 1, kind: input, shape index: {}]   ;;  %s1087_s2 = inlined_call_operand.hbm [shape: f32[2,8,128], index: 2, kind: output, shape index: {}]  }
   0x1   :  { %9 = vsyncpa [#allocation3 + $0x1], 0 }
   0x2   :  { %10 = vsyncpa [#allocation6], 0 }
   0x3   :  { %12 = vsyncpa [#allocation6 + $0x1], 0 }
   0x4   :  { %13 = vsyncpa [#allocation4], 0 }
   0x5   :  { %15 = vsyncpa [#allocation4 + $0x1], 0  ;;  %s782_s9 = smov 0   ;;  %s784_s10 = smov 0  }
   0x6   :  { %s786_s11 = smov 0   ;;  %s788_s12 = smov 0  }
   0x7   :  { %s790_s13 = smov 0   ;;  %s792_s14 = smov 0  }
   0x8 LB: > { %s492_s15 = sadd.s32 4294967295, %s760_s14   ;;  %s493_s16 = sadd.s32 4294967294, %s760_s14   ;;  %s760_s14 = sphi %s792_s14, %s21_s14   ;;  %s756_s13 = sphi %s790_s13, %s1105_s13   ;;  %s752_s12 = sphi %s788_s12, %s1104_s12   ;;  %s748_s11 = sphi %s786_s11, %s1103_s11   ;;  %s744_s10 = sphi %s784_s10, %s1102_s10   ;;  %s740_s9 = sphi %s782_s9, %s1101_s9  }
   0x9   : > { %s33_s17 = sadd.s32 1, %s756_s13  ;;  %s42_s18 = sadd.s32 1, %s748_s11 }
   0xa   : > { %p35_p0 = scmp.ge.s32.totalorder %s33_s17, 2  ;;  %p49_p1 = scmp.ne.s32.totalorder %s748_s11, %s744_s10 }
   0xb   : > { %p50_p2 = scmp.eq.s32.totalorder %s760_s14, 0  ;;  %p55_p3 = scmp.ne.s32.totalorder %s744_s10, %s740_s9 }
   0xc   : > { %s1107_s17 = smov (%p35_p0, %s33_s17), 0  ;;  %p56_p5 = scmp.eq.s32.totalorder %s492_s15, 0 }
   0xd   : > { %p823_p4 = por %p50_p2, %p49_p1  ;;  %s39_s20 = ssub.s32 %s756_s13, %s1107_s17 }
   0xe   : > { %p107_p6 = scmp.eq.s32.totalorder %s492_s15, 1  ;;  %p40_p7 = scmp.eq.s32.totalorder %s39_s20, 0 }
   0xf   : > { %p829_p8 = por %p56_p5, %p55_p3  ;;  %p113_p10 = scmp.eq.s32.totalorder %s493_s16, 1 }
  0x10   : > { %p833_p9 = por %p107_p6, %p49_p1  ;;  %p529_p13 = scmp.lt.s32.totalorder %s760_s14, 2 }
  0x11   : > { %s1091_s21 = scalar_select %p829_p8, 1, 0 }
  0x12   : > { %s1092_s22 = scalar_select %p833_p9, 1, 0 }
  0x13   : > { %s838_s23 = scalar_select %p40_p7, %s748_s11, %s42_s18  }
  0x14   : > { %p840_p11 = por %p113_p10, %p55_p3  ;;  %s847_s25 = sand.u32 1, %s748_s11  }
  0x15   : > { %s496_s26 = sshll.u32 %s847_s25, 7  ;;  %s510_s27 = sshll.u32 %s756_s13, 11 }
  0x16   : > { %s1093_s24 = scalar_select %p840_p11, 1, 0 }
  0x17   : > { %s856_s30 = scalar_lea.hbm %s1085_s0, %s510_s27  ;;  %s137_s3 = scalar_lea.vmem [#allocation2], %s496_s26 }
  0x18   : > { %s145_s4 = sshll.u32 %s137_s3, 4  ;;  %p864_p0 = pnand %p529_p13, %p823_p4  ;;  %s860_s4 = int_to_ptr.vmem [resolvable:$true] %s145_s4 }
  0x19   : > { %s134_s6 = scalar_lea.sflag [#allocation3], %s847_s25  ;;  %s614_s7 = scalar_lea.hbm %s856_s30, 2048 }
  0x1a   : > { %p615_p2 = scmp.ne.s32.totalorder %s856_s30, %s614_s7  ;;  %p616_p3 = pneg %p864_p0 }
  0x1b   : > { %s619_s16 = scalar_lea.hbm %s1085_s0, 4096  ;;  %p620_p4 = scmp.lt.u32.totalorder %s856_s30, %s1085_s0 }
  0x1c   : > { %p617_p5 = pnand %p616_p3, %p615_p2  ;;  %p621_p7 = scmp.lt.u32.totalorder %s619_s16, %s614_s7 }
  0x1d   : > { %p623_p13 = scmp.lt.u32.totalorder %s614_s7, %s856_s30 }
  0x1e   : > { %p618_p6 = pneg %p617_p5  ;;  %p622_p10 = por %p621_p7, %p620_p4 }
  0x20   : > { %p624_p12 = por %p623_p13, %p622_p10 }
  0x22   : > { %p625_p1 = pnand %p624_p12, %p618_p6 }
  0x24   : > { %628 = shalt.err (!%p625_p1)
}
  0x25   : > { %s629_s20 = scalar_lea.vmem %s860_s4, 2048  ;;  %s762_s28 = smov [#allocation2]  }
  0x26   : > { %p630_p2 = scmp.ne.s32.totalorder %s860_s4, %s629_s20  ;;  %s634_s29 = sshll.u32 %s762_s28, 4  ;;  %s635_s29 = int_to_ptr.vmem [resolvable:$false] %s634_s29 }
  0x27   : > { %s636_s3 = scalar_lea.vmem %s635_s29, 4096  ;;  %p637_p9 = scmp.lt.s32.totalorder %s860_s4, %s635_s29 }
  0x28   : > { %p632_p5 = pnand %p630_p2, %p616_p3  ;;  %p638_p4 = scmp.lt.s32.totalorder %s636_s3, %s629_s20 }
  0x2a   : > { %p633_p11 = pneg %p632_p5  ;;  %p639_p7 = por %p638_p4, %p637_p9 }
  0x2c   : > { %p640_p10 = pnand %p639_p7, %p633_p11 }
  0x2e   : > { %643 = shalt.err (!%p640_p10)
}
  0x2f   : > { %s763_s7 = smov 128   ;;  %s764_s8 = smov 8  }
  0x30   : > { %521 = dma.hbm_to_vmem [thread:$0]  (!%p864_p0), %s856_s30, 2048, %s860_s4, %s134_s6, %s763_s7, %s763_s7, %s764_s8  }
  0x31   : > { %p175_p9 = scmp.lt.s32.totalorder %s760_s14, 3  ;;  %s906_s18 = scalar_lea.hbm %s1086_s1, %s510_s27 }
  0x32   : > { %p1095_p11 = scmp.ge.s32.totalorder %s760_s14, 1  ;;  %s159_s20 = scalar_lea.vmem [#allocation5], %s496_s26 }
  0x33   : > { %s167_s28 = sshll.u32 %s159_s20, 4  ;;  %s156_s30 = scalar_lea.sflag [#allocation6], %s847_s25  ;;  %s916_s28 = int_to_ptr.vmem [resolvable:$true] %s167_s28 }
  0x34   : > { %p910_p12 = pnand %p1095_p11, %p175_p9  ;;  %s644_s4 = scalar_lea.hbm %s906_s18, 2048 }
  0x35   : > { %p645_p1 = scmp.ne.s32.totalorder %s906_s18, %s644_s4  ;;  %s649_s29 = scalar_lea.hbm %s1086_s1, 4096 }
  0x36   : > { %p650_p2 = scmp.lt.u32.totalorder %s906_s18, %s1086_s1  ;;  %p651_p5 = scmp.lt.u32.totalorder %s649_s29, %s644_s4 }
  0x37   : > { %p647_p6 = pnand %p645_p1, %p616_p3  ;;  %p653_p7 = scmp.lt.u32.totalorder %s644_s4, %s906_s18 }
  0x38   : > { %p652_p4 = por %p651_p5, %p650_p2 }
  0x39   : > { %p648_p13 = pneg %p647_p6 }
  0x3a   : > { %p654_p10 = por %p653_p7, %p652_p4 }
  0x3c   : > { %p655_p9 = pnand %p654_p10, %p648_p13 }
  0x3e   : > { %658 = shalt.err (!%p655_p9)
}
  0x3f   : > { %s659_s26 = scalar_lea.vmem %s916_s28, 2048  ;;  %s765_s16 = smov [#allocation5]  }
  0x40   : > { %p660_p11 = scmp.ne.s32.totalorder %s916_s28, %s659_s26  ;;  %s664_s20 = sshll.u32 %s765_s16, 4  ;;  %s665_s20 = int_to_ptr.vmem [resolvable:$false] %s664_s20 }
  0x41   : > { %s666_s27 = scalar_lea.vmem %s665_s20, 4096  ;;  %p667_p8 = scmp.lt.s32.totalorder %s916_s28, %s665_s20 }
  0x42   : > { %p662_p1 = pnand %p660_p11, %p616_p3  ;;  %p668_p2 = scmp.lt.s32.totalorder %s666_s27, %s659_s26 }
  0x44   : > { %p663_p6 = pneg %p662_p1  ;;  %p669_p5 = por %p668_p2, %p667_p8 }
  0x46   : > { %p670_p4 = pnand %p669_p5, %p663_p6 }
  0x48   : > { %673 = shalt.err (!%p670_p4)
}
  0x49   : > { %524 = dma.hbm_to_vmem [thread:$0]  (!%p864_p0), %s906_s18, 2048, %s916_s28, %s156_s30, %s763_s7, %s763_s7, %s764_s8  }
  0x4a   : > { %179 = sbr.rel (%p910_p12) target bundleno = 147 (0x93), region = 28  ;;  %s950_s4 = sand.u32 (!%p910_p12), 1, %s744_s10  }
  0x4b   : > { %s503_s6 = sshll.u32 (!%p910_p12), %s950_s4, 7  ;;  %s182_s29 = scalar_lea.sflag (!%p910_p12), [#allocation3], %s950_s4 }
  0x4c   : > { %s954_s5 = scalar_lea.vmem (!%p910_p12), [#allocation2], %s503_s6  ;;  %p1097_p8 = scmp.ne.s32.totalorder (!%p910_p12), %s1091_s21, 0 }
  0x51   : > { %727 = dma.done.wait (%p1097_p8), %s182_s29, 2048  }
  0x52   : > { %729 = vsyncadd (%p1097_p8), %s182_s29, 4294965248  ;;  %s191_s25 = scalar_lea.sflag [#allocation6], %s950_s4  ;;  %s961_s7 = scalar_lea.vmem [#allocation5], %s503_s6 }
  0x53   : > { %731 = dma.done.wait (%p1097_p8), %s191_s25, 2048  }
  0x54   : > { %733 = vsyncadd (%p1097_p8), %s191_s25, 4294965248  ;;  %v245_v0 = vld [vmem:[%s961_s7] sm:$0xff]  ;;  %v246_v1 = vld [vmem:[%s961_s7 + $0x8] sm:$0xff]  ;;  %s505_s21 = sshll.u32 %s950_s4, 3  ;;  %s507_s8 = sshll.u32 %s752_s12, 7 }
  0x55   : > { %v247_v2 = vld [vmem:[%s961_s7 + $0x10] sm:$0xff]  ;;  %v248_v3 = vld [vmem:[%s961_s7 + $0x18] sm:$0xff]  ;;  %v261_v4 = vmul.f32 1.442695, %v245_v0  ;;  %v249_v5 = vld [vmem:[%s961_s7 + $0x20] sm:$0xff]  ;;  %v293_v24 = vadd.f32 1.0, %v245_v0  ;;  %s1036_s3 = scalar_lea.hbm %s1087_s2, %s507_s8 }
  0x56   : > { %v250_v6 = vld [vmem:[%s961_s7 + $0x28] sm:$0xff]  ;;  %v263_v7 = vmul.f32 1.442695, %v246_v1  ;;  %v251_v8 = vld [vmem:[%s961_s7 + $0x30] sm:$0xff]  ;;  %v975_v9 = vld [vmem:[%s961_s7 + $0x38] sm:$0xff]  ;;  %v294_v26 = vadd.f32 1.0, %v246_v1 }
  0x57   : > { %582 = vpow2.f32 %v261_v4  ;;  %v265_v10 = vmul.f32 1.442695, %v247_v2  ;;  %v267_v11 = vmul.f32 1.442695, %v248_v3  ;;  %v978_v12 = vld [vmem:[%s961_s7 + $0x40] sm:$0xff]  ;;  %v982_v17 = vld [vmem:[%s961_s7 + $0x48] sm:$0xff] }
  0x58   : > { %584 = vpow2.f32 %v263_v7  ;;  %v269_v13 = vmul.f32 1.442695, %v249_v5  ;;  %v271_v14 = vmul.f32 1.442695, %v250_v6  ;;  %v273_v15 = vmul.f32 1.442695, %v251_v8 }
  0x59   : > { %586 = vpow2.f32 %v265_v10  ;;  %v275_v16 = vmul.f32 1.442695, %v975_v9  ;;  %v277_v18 = vmul.f32 1.442695, %v978_v12  ;;  %v229_v19 = vld [vmem:[%s954_s5] sm:$0xff]  ;;  %v987_v20 = vld [vmem:[%s961_s7 + $0x50] sm:$0xff] }
  0x5a   : > { %588 = vpow2.f32 %v267_v11  ;;  %v230_v21 = vld [vmem:[%s954_s5 + $0x8] sm:$0xff]  ;;  %v231_v22 = vld [vmem:[%s954_s5 + $0x10] sm:$0xff]  ;;  %v279_v23 = vmul.f32 1.442695, %v982_v17  ;;  %v993_v25 = vld [vmem:[%s961_s7 + $0x58] sm:$0xff]  ;;  %v295_v30 = vadd.f32 1.0, %v247_v2  ;;  %v325_v31 = vmul.f32 %v229_v19, %v229_v19 }
  0x5b   : > { %590 = vpow2.f32 %v269_v13  ;;  %v232_v27 = vld [vmem:[%s954_s5 + $0x18] sm:$0xff]  ;;  %v233_v28 = vld [vmem:[%s954_s5 + $0x20] sm:$0xff]  ;;  %v281_v29 = vmul.f32 1.442695, %v987_v20  ;;  %v296_v34 = vadd.f32 1.0, %v248_v3  ;;  %v326_v35 = vmul.f32 %v230_v21, %v230_v21  ;;  %v234_v38 = vld [vmem:[%s954_s5 + $0x28] sm:$0xff] }
  0x5c   : > { %592 = vpow2.f32 %v271_v14  ;;  %v999_v33 = vld [vmem:[%s961_s7 + $0x60] sm:$0xff]  ;;  %v327_v36 = vmul.f32 %v231_v22, %v231_v22  ;;  %v283_v39 = vmul.f32 1.442695, %v993_v25  ;;  %v297_v40 = vadd.f32 1.0, %v249_v5  ;;  %v1004_v43 = vld [vmem:[%s961_s7 + $0x68] sm:$0xff]  ;;  %v235_v53 = vld [vmem:[%s954_s5 + $0x30] sm:$0xff] }
  0x5d   : > { %594 = vpow2.f32 %v273_v15  ;;  %v298_v44 = vadd.f32 1.0, %v250_v6  ;;  %v328_v46 = vmul.f32 %v232_v27, %v232_v27  ;;  %v329_v47 = vmul.f32 %v233_v28, %v233_v28  ;;  %v1009_v54 = vld [vmem:[%s961_s7 + $0x70] sm:$0xff]  ;;  %v236_v0 = vld [vmem:[%s954_s5 + $0x38] sm:$0xff]  ;;  %v237_v10 = vld [vmem:[%s954_s5 + $0x40] sm:$0xff]  ;;  %s219_s18 = scalar_lea.vmem [#allocation7], %s505_s21  ;;  %s376_s15 = scalar_lea.sflag [#allocation4], %s950_s4 }
  0x5e   : > { %596 = vpow2.f32 %v275_v16  ;;  %v285_v49 = vmul.f32 1.442695, %v999_v33  ;;  %v299_v55 = vadd.f32 1.0, %v251_v8  ;;  %v330_v57 = vmul.f32 %v234_v38, %v234_v38  ;;  %v260_v1 = vld [vmem:[%s961_s7 + $0x78] sm:$0xff]  ;;  %v238_v19 = vld [vmem:[%s954_s5 + $0x48] sm:$0xff]  ;;  %s389_s19 = sshll.u32 %s219_s18, 4  ;;  %s1038_s19 = int_to_ptr.vmem [resolvable:$true] %s389_s19 }
  0x5f   : > { %598 = vpow2.f32 %v277_v18  ;;  %v287_v60 = vmul.f32 1.442695, %v1004_v43  ;;  %v300_v2 = vadd.f32 1.0, %v975_v9  ;;  %v289_v7 = vmul.f32 1.442695, %v1009_v54  ;;  %s674_s26 = scalar_lea.vmem %s1038_s19, 128 }
  0x60   : > { %600 = vpow2.f32 %v279_v23  ;;  %v331_v8 = vmul.f32 %v235_v53, %v235_v53  ;;  %v301_v11 = vadd.f32 1.0, %v978_v12  ;;  %v291_v18 = vmul.f32 1.442695, %v260_v1  ;;  %v239_v12 = vld [vmem:[%s954_s5 + $0x50] sm:$0xff]  ;;  %p675_p0 = scmp.ne.s32.totalorder %s1038_s19, %s674_s26  ;;  %p1098_p3 = scmp.ne.s32.totalorder %s1092_s22, 0 }
  0x61   : > { %v583_v32 = vpop.eup %582  ;;  %602 = vpow2.f32 %v281_v29  ;;  %v332_v9 = vmul.f32 %v236_v0, %v236_v0  ;;  %v302_v21 = vadd.f32 1.0, %v982_v17  ;;  %v333_v27 = vmul.f32 %v237_v10, %v237_v10  ;;  %s766_s12 = smov [#allocation7]  }
  0x62   : > { %v585_v37 = vpop.eup %584  ;;  %v309_v41 = vsub.f32 %v583_v32, %v293_v24  ;;  %604 = vpow2.f32 %v283_v39  ;;  %v303_v28 = vadd.f32 1.0, %v987_v20  ;;  %v304_v17 = vadd.f32 1.0, %v993_v25  ;;  %p676_p12 = pnand %p675_p0, %p1098_p3  ;;  %s678_s16 = sshll.u32 %s766_s12, 4  ;;  %s679_s16 = int_to_ptr.vmem [resolvable:$false] %s678_s16 }
  0x63   : > { %v587_v42 = vpop.eup %586  ;;  %v310_v45 = vsub.f32 %v585_v37, %v294_v26  ;;  %606 = vpow2.f32 %v285_v49  ;;  %v306_v49 = vadd.f32 1.0, %v1004_v43  ;;  %s680_s20 = scalar_lea.vmem %s679_s16, 256  ;;  %p681_p7 = scmp.lt.s32.totalorder %s1038_s19, %s679_s16 }
  0x64   : > { %v589_v48 = vpop.eup %588  ;;  %v311_v50 = vsub.f32 %v587_v42, %v295_v30  ;;  %v341_v51 = vadd.f32 %v325_v31, %v309_v41  ;;  %608 = vpow2.f32 %v287_v60  ;;  %v241_v41 = vld [vmem:[%s954_s5 + $0x60] sm:$0xff]  ;;  %v305_v42 = vadd.f32 1.0, %v999_v33  ;;  %p677_p13 = pneg %p676_p12  ;;  %p682_p10 = scmp.lt.s32.totalorder %s680_s20, %s674_s26 }
  0x65   : > { %v591_v52 = vpop.eup %590  ;;  %v312_v56 = vsub.f32 %v589_v48, %v296_v34  ;;  %v342_v58 = vadd.f32 %v326_v35, %v310_v45  ;;  %610 = vpow2.f32 %v289_v7  ;;  %v334_v34 = vmul.f32 %v238_v19, %v238_v19  ;;  %v240_v35 = vld [vmem:[%s954_s5 + $0x58] sm:$0xff]  ;;  %v242_v48 = vld [vmem:[%s954_s5 + $0x68] sm:$0xff] }
  0x66   : > { %v593_v59 = vpop.eup %592  ;;  %v313_v61 = vsub.f32 %v591_v52, %v297_v40  ;;  %v343_v62 = vadd.f32 %v327_v36, %v311_v50  ;;  %612 = vpow2.f32 %v291_v18  ;;  %v335_v40 = vmul.f32 %v239_v12, %v239_v12  ;;  %p683_p9 = por %p682_p10, %p681_p7 }
  0x67   : > { %v595_v63 = vpop.eup %594  ;;  %v314_v3 = vsub.f32 %v593_v59, %v298_v44  ;;  %v344_v4 = vadd.f32 %v328_v46, %v312_v56  ;;  %v358_v5 = vadd.f32 %v342_v58, %v341_v51  ;;  %v337_v53 = vmul.f32 %v241_v41, %v241_v41  ;;  %v243_v59 = vld [vmem:[%s954_s5 + $0x70] sm:$0xff] }
  0x68   : > { %v597_v6 = vpop.eup %596  ;;  %v315_v13 = vsub.f32 %v595_v63, %v299_v55  ;;  %v345_v14 = vadd.f32 %v329_v47, %v313_v61  ;;  %v336_v47 = vmul.f32 %v240_v35, %v240_v35  ;;  %v307_v55 = vadd.f32 1.0, %v1009_v54  ;;  %p684_p11 = pnand %p683_p9, %p677_p13 }
  0x69   : > { %v359_v15 = vadd.f32 %v358_v5, %v343_v62  ;;  %v599_v16 = vpop.eup %598  ;;  %v316_v22 = vsub.f32 %v597_v6, %v300_v2  ;;  %v346_v23 = vadd.f32 %v330_v57, %v314_v3  ;;  %v338_v60 = vmul.f32 %v242_v48, %v242_v48  ;;  %v244_v2 = vld [vmem:[%s954_s5 + $0x78] sm:$0xff] }
  0x6a   : > { %v601_v26 = vpop.eup %600  ;;  %v317_v29 = vsub.f32 %v599_v16, %v301_v11  ;;  %v347_v30 = vadd.f32 %v331_v8, %v315_v13  ;;  %v308_v61 = vadd.f32 1.0, %v260_v1  ;;  %v340_v54 = vmul.f32 %v244_v2, %v244_v2 }
  0x6b   : > { %v360_v24 = vadd.f32 %v359_v15, %v344_v4  ;;  %v603_v32 = vpop.eup %602  ;;  %v318_v36 = vsub.f32 %v601_v26, %v302_v21  ;;  %v348_v37 = vadd.f32 %v332_v9, %v316_v22  ;;  %v339_v4 = vmul.f32 %v243_v59, %v243_v59 }
  0x6c   : > { %v605_v39 = vpop.eup %604  ;;  %v319_v44 = vsub.f32 %v603_v32, %v303_v28  ;;  %v349_v20 = vadd.f32 %v333_v27, %v317_v29 }
  0x6d   : > { %v361_v31 = vadd.f32 %v360_v24, %v345_v14  ;;  %v607_v46 = vpop.eup %606  ;;  %v320_v50 = vsub.f32 %v605_v39, %v304_v17  ;;  %v350_v51 = vadd.f32 %v334_v34, %v318_v36 }
  0x6e   : > { %v609_v52 = vpop.eup %608  ;;  %v321_v56 = vsub.f32 %v607_v46, %v305_v42  ;;  %v351_v57 = vadd.f32 %v335_v40, %v319_v44 }
  0x6f   : > { %v362_v38 = vadd.f32 %v361_v31, %v346_v23  ;;  %v611_v58 = vpop.eup %610  ;;  %v322_v62 = vsub.f32 %v609_v52, %v306_v49  ;;  %v352_v63 = vadd.f32 %v336_v47, %v320_v50 }
  0x70   : > { %v613_v43 = vpop.eup %612  ;;  %v323_v3 = vsub.f32 %v611_v58, %v307_v55  ;;  %v353_v5 = vadd.f32 %v337_v53, %v321_v56 }
  0x71   : > { %v363_v45 = vadd.f32 %v362_v38, %v347_v30  ;;  %v324_v7 = vsub.f32 %v613_v43, %v308_v61  ;;  %v354_v8 = vadd.f32 %v338_v60, %v322_v62 }
  0x72   : > { %v355_v11 = vadd.f32 %v339_v4, %v323_v3 }
  0x73   : > { %v364_v25 = vadd.f32 %v363_v45, %v348_v37  ;;  %v356_v1 = vadd.f32 %v340_v54, %v324_v7 }
  0x75   : > { %v365_v33 = vadd.f32 %v364_v25, %v349_v20 }
  0x77   : > { %v366_v0 = vadd.f32 %v365_v33, %v350_v51 }
  0x79   : > { %v367_v6 = vadd.f32 %v366_v0, %v351_v57 }
  0x7b   : > { %v368_v10 = vadd.f32 %v367_v6, %v352_v63 }
  0x7d   : > { %v369_v13 = vadd.f32 %v368_v10, %v353_v5 }
  0x7f   : > { %v370_v14 = vadd.f32 %v369_v13, %v354_v8 }
  0x81   : > { %v371_v15 = vadd.f32 %v370_v14, %v355_v11 }
  0x83   : > { %v372_v16 = vadd.f32 %v371_v15, %v356_v1 }
  0x85   : > { %374 = vst [vmem:[%s219_s18] sm:$0xff] %v372_v16 }
  0x86   : > { %687 = shalt.err (!%p684_p11)
}
  0x87   : > { %s688_s27 = scalar_lea.hbm %s1036_s3, 128  ;;  %s692_s29 = scalar_lea.hbm %s1087_s2, 256 }
  0x88   : > { %p689_p1 = scmp.ne.s32.totalorder %s1036_s3, %s688_s27  ;;  %p693_p5 = scmp.lt.u32.totalorder %s1036_s3, %s1087_s2 }
  0x89   : > { %p694_p4 = scmp.lt.u32.totalorder %s692_s29, %s688_s27  ;;  %p696_p0 = scmp.lt.u32.totalorder %s688_s27, %s1036_s3 }
  0x8a   : > { %p690_p6 = pnand %p689_p1, %p1098_p3 }
  0x8b   : > { %p695_p8 = por %p694_p4, %p693_p5 }
  0x8c   : > { %p691_p2 = pneg %p690_p6 }
  0x8d   : > { %p697_p12 = por %p696_p0, %p695_p8 }
  0x8f   : > { %p698_p13 = pnand %p697_p12, %p691_p2 }
  0x91   : > { %701 = shalt.err (!%p698_p13)
}
  0x92   : > { %516 = dma.vmem_to_hbm [thread:$0]  (%p1098_p3), %s1038_s19, 128, %s1036_s3, %s376_s15  }
  0x93 PF: > { %s401_s7 = sand.u32 1, %s740_s9   ;;  %p1099_p7 = scmp.ne.s32.totalorder %s1093_s24, 0 }
  0x94   : > { %p1100_p10 = scmp.ge.s32.totalorder %s760_s14, 2  ;;  %s402_s21 = scalar_lea.sflag [#allocation4], %s401_s7 }
  0x96   : > { %p526_p9 = pnand %p1100_p10, %p1099_p7 }
  0x98   : > { %735 = dma.done.wait (!%p526_p9), %s402_s21, 128  }
  0x99   : > { %737 = vsyncadd (!%p526_p9), %s402_s21, 4294967168  ;;  %s21_s14 = sadd.s32 1, %s760_s14   ;;  %s1101_s9 = smov %s744_s10 }
  0x9a   : > { %p18_p11 = scmp.ge.s32.totalorder %s21_s14, 4   ;;  %s1102_s10 = smov %s748_s11 }
  0x9b   : > { %s1103_s11 = smov %s838_s23  ;;  %s1104_s12 = smov %s756_s13 }
  0x9c   : > { %s1105_s13 = smov %s1107_s17  ;;  %20 = sbr.rel (!%p18_p11) target bundleno = 8 (0x8), region = 90 }
  0xa3   :  { %407 = vsyncpa [#allocation3], 1 }
  0xa4   :  { %409 = vsyncpa [#allocation3 + $0x1], 1 }
  0xa5   :  { %410 = vsyncpa [#allocation6], 1 }
  0xa6   :  { %412 = vsyncpa [#allocation6 + $0x1], 1 }
  0xa7   :  { %413 = vsyncpa [#allocation4], 1 }
  0xa8   :  { %415 = vsyncpa [#allocation4 + $0x1], 1 }

</bundles_post_ra>
